<compile_context>
chip_gen: v7x
topology: tpu7x:2x2x1
jax: 0.10.0
libtpu: 0.0.40
codegen_flags: <defaults>
</compile_context>

<pallas_src>
import functools

import jax
import jax.numpy as jnp
from jax.experimental import pallas as pl
from jax.experimental.pallas import tpu as pltpu


_ACTIVATIONS = {
    "relu": lambda v: jnp.maximum(v, 0.0),
    "sigmoid": jax.nn.sigmoid,
    "tanh": jnp.tanh,
    "leaky_relu": lambda v: jnp.where(v > 0, v, 0.01 * v),
}


def _two_layer_kernel(rw_ref, x_ref, w1_ref, b1_ref, w2_ref, b2_ref, o_ref,
                      *, add_residual: bool, activation):
    x = x_ref[...]                                              # (TB, IN), native dtype
    # linear1 (+ bias, activation). MXU in bf16, f32 accumulation.
    h = jnp.dot(x.astype(w1_ref.dtype), w1_ref[...],
                preferred_element_type=jnp.float32)             # (TB, HID_P)
    h = activation(h + b1_ref[...])                             # (1, HID_P) broadcast
    # linear2 (+ bias).
    out = jnp.dot(h.astype(w2_ref.dtype), w2_ref[...],
                  preferred_element_type=jnp.float32)           # (TB, OUT)
    out = out + b2_ref[...]
    if add_residual:
        out = rw_ref[0, 0] * out + x.astype(jnp.float32)
    o_ref[...] = out.astype(o_ref.dtype)


def prepare_two_layer_params(w1, b1, w2, b2, residual_weight,
                             compute_dtype=jnp.bfloat16):
    """One-time parameter prep (call at adapter init, NOT per forward call).

    Transposes the nn.Linear weights to [K, N] layout, zero-pads the hidden
    dim to a lane-dense multiple of 128, and casts matmul operands to bf16.
    """
    hid, in_f = w1.shape
    out_f = w2.shape[0]
    hid_p = max(128, ((hid + 127) // 128) * 128)

    w1t = jnp.zeros((in_f, hid_p), compute_dtype)
    w1t = w1t.at[:, :hid].set(jnp.asarray(w1, compute_dtype).T)     # (IN, HID_P)
    b1p = jnp.zeros((1, hid_p), jnp.float32)
    b1p = b1p.at[:, :hid].set(jnp.asarray(b1, jnp.float32)[None, :])
    w2t = jnp.zeros((hid_p, out_f), compute_dtype)
    w2t = w2t.at[:hid, :].set(jnp.asarray(w2, compute_dtype).T)     # (HID_P, OUT)
    b2p = jnp.asarray(b2, jnp.float32).reshape(1, out_f)
    rw = jnp.asarray(residual_weight, jnp.float32).reshape(1, 1)
    return {"w1t": w1t, "b1": b1p, "w2t": w2t, "b2": b2p, "rw": rw}


def two_layer_nn_forward(embed, params, add_residual: bool = False,
                         activation_fn_str: str = "relu",
                         out_dtype=jnp.float32):
    """embed: (B, in_features); params: output of prepare_two_layer_params."""
    B, in_f = embed.shape
    w1t, b1p, w2t, b2p, rw = (params["w1t"], params["b1"], params["w2t"],
                              params["b2"], params["rw"])
    assert w1t.shape[0] == in_f, "embed feature dim mismatch with linear1"
    hid_p = w1t.shape[1]
    out_f = w2t.shape[1]
    if add_residual:
        assert out_f == in_f, (
            "add_residual=True requires out_features == in_features "
            f"(got out={out_f}, in={in_f})")
    if activation_fn_str not in _ACTIVATIONS:
        raise ValueError(f"Unknown activation function: {activation_fn_str}")

    # Batch tile: one tile if B is small, else 512-row tiles (multiple of 8)
    # so the activation DMAs double-buffer behind the matmuls.
    TB = B if B <= 512 else 512
    grid = (pl.cdiv(B, TB),)

    # VMEM budget: double-buffered activation in/out + resident weights +
    # f32 intermediates. Sized so it fits v7x's 64 MiB VMEM with headroom.
    act_itemsize = jnp.dtype(embed.dtype).itemsize
    w_itemsize = jnp.dtype(w1t.dtype).itemsize
    vmem_need = (2 * TB * in_f * act_itemsize            # embed (double-buffered)
                 + 2 * TB * out_f * 4                    # output (double-buffered)
                 + (in_f * hid_p + hid_p * out_f) * w_itemsize
                 + (hid_p + out_f) * 4                   # biases
                 + TB * (hid_p + out_f) * 4)             # f32 intermediates
    vmem_limit = int(min(60 * 1024 * 1024, max(4 * vmem_need, 8 * 1024 * 1024)))

    cost = pl.CostEstimate(
        flops=2 * B * (in_f * hid_p + hid_p * out_f),
        transcendentals=0,
        bytes_accessed=(B * in_f * act_itemsize
                        + (in_f * hid_p + hid_p * out_f) * w_itemsize
                        + (hid_p + out_f) * 4
                        + B * out_f * jnp.dtype(out_dtype).itemsize),
    )

    kernel = functools.partial(_two_layer_kernel,
                               add_residual=add_residual,
                               activation=_ACTIVATIONS[activation_fn_str])

    return pl.pallas_call(
        kernel,
        out_shape=jax.ShapeDtypeStruct((B, out_f), out_dtype),
        grid_spec=pltpu.PrefetchScalarGridSpec(
            num_scalar_prefetch=0,
            grid=grid,
            in_specs=[
                pl.BlockSpec((1, 1), lambda i: (0, 0),
                             memory_space=pltpu.SMEM),            # residual weight
                pl.BlockSpec((TB, in_f), lambda i: (i, 0)),       # embed (tiled)
                pl.BlockSpec((in_f, hid_p), lambda i: (0, 0)),    # w1t (resident)
                pl.BlockSpec((1, hid_p), lambda i: (0, 0)),       # b1
                pl.BlockSpec((hid_p, out_f), lambda i: (0, 0)),   # w2t (resident)
                pl.BlockSpec((1, out_f), lambda i: (0, 0)),       # b2
            ],
            out_specs=pl.BlockSpec((TB, out_f), lambda i: (i, 0)),
        ),
        compiler_params=pltpu.CompilerParams(
            dimension_semantics=("parallel",),
            vmem_limit_bytes=vmem_limit),
        cost_estimate=cost,
    )(rw, embed, w1t, b1p, w2t, b2p)


if __name__ == "__main__":
    # Shapes consistent with the adapter: in=128, hidden=64 (padded to 128
    # internally), out=128. B=1024 so the batch grid actually tiles (TB=512).
    B, IN, HID, OUT = 1024, 128, 64, 128

    key = jax.random.PRNGKey(0)
    k_x, k_w1, k_b1, k_w2, k_b2 = jax.random.split(key, 5)

    embed = jax.random.normal(k_x, (B, IN), dtype=jnp.float32)
    w1 = jax.random.normal(k_w1, (HID, IN), dtype=jnp.float32) * 0.05
    b1 = jax.random.normal(k_b1, (HID,), dtype=jnp.float32) * 0.01
    w2 = jax.random.normal(k_w2, (OUT, HID), dtype=jnp.float32) * 0.05
    b2 = jax.random.normal(k_b2, (OUT,), dtype=jnp.float32) * 0.01
    residual_weight = jnp.full((1,), 0.3, dtype=jnp.float32)

    # One-time prep (transpose / pad / bf16 cast), then the hot-path call.
    params = prepare_two_layer_params(w1, b1, w2, b2, residual_weight)

    out = two_layer_nn_forward(embed, params, add_residual=False)
    out = jax.block_until_ready(out)

    # Pure-JAX f32 reference (bf16 MXU operands -> looser tolerance).
    h_ref = jnp.maximum(embed @ w1.T + b1, 0.0)
    ref = h_ref @ w2.T + b2
    assert jnp.allclose(out, ref, atol=3e-2, rtol=3e-2), "mismatch (no residual)"

    out_res = two_layer_nn_forward(embed, params, add_residual=True)
    out_res = jax.block_until_ready(out_res)
    ref_res = 0.3 * ref + embed
    assert jnp.allclose(out_res, ref_res, atol=3e-2, rtol=3e-2), "mismatch (residual)"

    # TODO(synk): BaseAdapter.save/load (file + json I/O) has no Pallas equivalent.
    print("KERNEL_OK")
</pallas_src>

<mosaic_0001>
module attributes {stable_mosaic.version = 11 : i64} {
  func.func @_two_layer_kernel(%arg0: i32, %arg1: memref<1x1xf32, #tpu.memory_space<smem>>, %arg2: memref<512x128xf32, #tpu.memory_space<vmem>>, %arg3: memref<128x128xbf16, #tpu.memory_space<vmem>>, %arg4: memref<1x128xf32, #tpu.memory_space<vmem>>, %arg5: memref<128x128xbf16, #tpu.memory_space<vmem>>, %arg6: memref<1x128xf32, #tpu.memory_space<vmem>>, %arg7: memref<512x128xf32, #tpu.memory_space<vmem>>) attributes {dimension_semantics = [#tpu.dimension_semantics<parallel>], iteration_bounds = array<i64: 2>, scalar_prefetch = 0 : i64, scratch_operands = 0 : i64, tpu.core_type = #tpu.core_type<tc>, window_params = [{transform_indices = @transform_0, window_bounds = array<i64: 1, 1>}, {transform_indices = @transform_1, window_bounds = array<i64: 512, 128>}, {pipeline_mode = #tpu.pipeline_mode<synchronous>, transform_indices = @transform_2, window_bounds = array<i64: 128, 128>}, {pipeline_mode = #tpu.pipeline_mode<synchronous>, transform_indices = @transform_3, window_bounds = array<i64: 1, 128>}, {pipeline_mode = #tpu.pipeline_mode<synchronous>, transform_indices = @transform_4, window_bounds = array<i64: 128, 128>}, {pipeline_mode = #tpu.pipeline_mode<synchronous>, transform_indices = @transform_5, window_bounds = array<i64: 1, 128>}, {transform_indices = @transform_6, window_bounds = array<i64: 512, 128>}]} {
    %c0 = arith.constant 0 : index
    %c0_0 = arith.constant 0 : index
    %0 = vector.load %arg2[%c0, %c0_0] : memref<512x128xf32, #tpu.memory_space<vmem>>, vector<512x128xf32>
    %1 = arith.truncf %0 : vector<512x128xf32> to vector<512x128xbf16>
    %c0_1 = arith.constant 0 : index
    %c0_2 = arith.constant 0 : index
    %2 = vector.load %arg3[%c0_1, %c0_2] : memref<128x128xbf16, #tpu.memory_space<vmem>>, vector<128x128xbf16>
    %cst = arith.constant dense<0.000000e+00> : vector<512x128xf32>
    %3 = tpu.matmul %1, %2, %cst {dimension_numbers = #tpu.dot_dimension_numbers<[1], [0], [0], [1], [0, 0, 1, 1], [], []>} : vector<512x128xbf16>, vector<128x128xbf16>, vector<512x128xf32> -> vector<512x128xf32>
    %c0_3 = arith.constant 0 : index
    %c0_4 = arith.constant 0 : index
    %4 = vector.load %arg4[%c0_3, %c0_4] : memref<1x128xf32, #tpu.memory_space<vmem>>, vector<1x128xf32>
    %5 = vector.broadcast %4 : vector<1x128xf32> to vector<512x128xf32>
    %6 = arith.addf %3, %5 : vector<512x128xf32>
    %cst_5 = arith.constant 0.000000e+00 : f32
    %7 = vector.broadcast %cst_5 : f32 to vector<512x128xf32>
    %8 = arith.maximumf %6, %7 : vector<512x128xf32>
    %9 = arith.truncf %8 : vector<512x128xf32> to vector<512x128xbf16>
    %c0_6 = arith.constant 0 : index
    %c0_7 = arith.constant 0 : index
    %10 = vector.load %arg5[%c0_6, %c0_7] : memref<128x128xbf16, #tpu.memory_space<vmem>>, vector<128x128xbf16>
    %cst_8 = arith.constant dense<0.000000e+00> : vector<512x128xf32>
    %11 = tpu.matmul %9, %10, %cst_8 {dimension_numbers = #tpu.dot_dimension_numbers<[1], [0], [0], [1], [0, 0, 1, 1], [], []>} : vector<512x128xbf16>, vector<128x128xbf16>, vector<512x128xf32> -> vector<512x128xf32>
    %c0_9 = arith.constant 0 : index
    %c0_10 = arith.constant 0 : index
    %12 = vector.load %arg6[%c0_9, %c0_10] : memref<1x128xf32, #tpu.memory_space<vmem>>, vector<1x128xf32>
    %13 = vector.broadcast %12 : vector<1x128xf32> to vector<512x128xf32>
    %14 = arith.addf %11, %13 : vector<512x128xf32>
    %c0_11 = arith.constant 0 : index
    %c0_12 = arith.constant 0 : index
    %15 = vector.load %arg7[%c0_11, %c0_12] : memref<512x128xf32, #tpu.memory_space<vmem>>, vector<512x128xf32>
    tpu.vector_store %arg7[%c0_11, %c0_12], %14 {strides = array<i32>} : memref<512x128xf32, #tpu.memory_space<vmem>>, vector<512x128xf32>,
    return
  }
  func.func @transform_0(%arg0: i32) -> (i32, i32) {
    %c0_i32 = arith.constant 0 : i32
    %c0_i32_0 = arith.constant 0 : i32
    %c0_i32_1 = arith.constant 0 : i32
    return %c0_i32, %c0_i32_0 : i32, i32
  }
  func.func @transform_1(%arg0: i32) -> (i32, i32) {
    %c0_i32 = arith.constant 0 : i32
    %c0_i32_0 = arith.constant 0 : i32
    return %arg0, %c0_i32 : i32, i32
  }
  func.func @transform_2(%arg0: i32) -> (i32, i32) {
    %c0_i32 = arith.constant 0 : i32
    %c0_i32_0 = arith.constant 0 : i32
    %c0_i32_1 = arith.constant 0 : i32
    return %c0_i32, %c0_i32_0 : i32, i32
  }
  func.func @transform_3(%arg0: i32) -> (i32, i32) {
    %c0_i32 = arith.constant 0 : i32
    %c0_i32_0 = arith.constant 0 : i32
    %c0_i32_1 = arith.constant 0 : i32
    return %c0_i32, %c0_i32_0 : i32, i32
  }
  func.func @transform_4(%arg0: i32) -> (i32, i32) {
    %c0_i32 = arith.constant 0 : i32
    %c0_i32_0 = arith.constant 0 : i32
    %c0_i32_1 = arith.constant 0 : i32
    return %c0_i32, %c0_i32_0 : i32, i32
  }
  func.func @transform_5(%arg0: i32) -> (i32, i32) {
    %c0_i32 = arith.constant 0 : i32
    %c0_i32_0 = arith.constant 0 : i32
    %c0_i32_1 = arith.constant 0 : i32
    return %c0_i32, %c0_i32_0 : i32, i32
  }
  func.func @transform_6(%arg0: i32) -> (i32, i32) {
    %c0_i32 = arith.constant 0 : i32
    %c0_i32_0 = arith.constant 0 : i32
    return %arg0, %c0_i32 : i32, i32
  }
}

</mosaic_0001>

<bundles_post_ra>
// kernel: tpu_custom_call.1
= control target key start
LH: loop header
LB: loop body
LE: loop exit
PB: predicated region body
PF: predicated region fallthrough
CT: control target
= control target key end

     0   :  { %12 = vsyncpa [#allocation4], 0  ;;  %s2464_s0 = inlined_call_operand.<no memory space> [shape: f32[1,1], index: 0, kind: input, shape index: {}]   ;;  %s2465_s1 = inlined_call_operand.hbm [shape: f32[1024,128], index: 1, kind: input, shape index: {}]   ;;  %s2466_s2 = inlined_call_operand.hbm [shape: bf16[128,128], index: 2, kind: input, shape index: {}]   ;;  %s2467_s3 = inlined_call_operand.vmem [shape: f32[1,128], index: 3, kind: input, shape index: {}]   ;;  %s2468_s4 = inlined_call_operand.hbm [shape: bf16[128,128], index: 4, kind: input, shape index: {}]   ;;  %s2469_s5 = inlined_call_operand.vmem [shape: f32[1,128], index: 5, kind: input, shape index: {}]   ;;  %s2470_s6 = inlined_call_operand.hbm [shape: f32[1024,128], index: 6, kind: output, shape index: {}]  }
   0x1   :  { %14 = vsyncpa [#allocation4 + $0x1], 0 }
   0x2   :  { %15 = vsyncpa [#allocation7], 0 }
   0x3   :  { %16 = vsyncpa [#allocation5], 0 }
   0x4   :  { %18 = vsyncpa [#allocation5 + $0x1], 0  ;;  %s1955_s0 = smov 0   ;;  %s1957_s21 = smov 0  }
   0x5   :  { %s1959_s22 = smov 0   ;;  %s1961_s23 = smov 0  }
   0x6 LB: > { %s1976_s24 = sadd.s32 4294967295, %s1908_s23   ;;  %s1385_s25 = sadd.s32 4294967294, %s1908_s23   ;;  %s1908_s23 = sphi %s1961_s23, %s2490_s23   ;;  %s1904_s22 = sphi %s1959_s22, %s2489_s22   ;;  %s1900_s21 = sphi %s1957_s21, %s2488_s21   ;;  %s1896_s0 = sphi %s1955_s0, %s2487_s0  }
   0x7   : > { %p65_p0 = scmp.ne.s32.totalorder %s1900_s21, %s1896_s0  ;;  %p2471_p1 = scmp.eq.s32.totalorder %s1976_s24, 0 }
   0x8   : > { %p179_p3 = scmp.eq.s32.totalorder %s1385_s25, 1  ;;  %p1386_p5 = scmp.ge.s32.totalorder %s1908_s23, 1 }
   0x9   : > { %p1985_p4 = por %p2471_p1, %p65_p0  ;;  %p186_p7 = scmp.lt.s32.totalorder %s1908_s23, 3 }
   0xa   : > { %p1990_p6 = por %p179_p3, %p65_p0  ;;  %s1910_s29 = smov [#allocation6]  }
   0xb   : > { %s2474_s26 = scalar_select %p1985_p4, 1, 0 }
   0xc   : > { %s2475_s27 = scalar_select %p1990_p6, 1, 0 }
   0xd   : > { %p1995_p8 = pnand %p1386_p5, %p186_p7  ;;  %s201_s30 = sshll.u32 %s1910_s29, 4  ;;  %s1999_s30 = int_to_ptr.vmem [resolvable:$true] %s201_s30 }
   0xe   : > { %s1911_s8 = smov [#allocation8]   ;;  %s1752_s12 = scalar_lea.hbm %s2466_s2, 1024 }
   0xf   : > { %p1675_p9 = pneg %p1995_p8  ;;  %s217_s9 = sshll.u32 %s1911_s8, 4  ;;  %s2010_s9 = int_to_ptr.vmem [resolvable:$true] %s217_s9 }
  0x10   : > { %p1753_p12 = scmp.ne.s32.totalorder %s2466_s2, %s1752_s12  ;;  %p1759_p5 = scmp.lt.u32.totalorder %s1752_s12, %s2466_s2 }
  0x11   : > { %p2006_p11 = pnand %p1675_p9, %p2471_p1 }
  0x13   : > { %p1754_p13 = pneg %p2006_p11 }
  0x15   : > { %p1755_p0 = pnand %p1754_p13, %p1753_p12 }
  0x17   : > { %p1756_p3 = pneg %p1755_p0 }
  0x19   : > { %p1761_p7 = pnand %p1759_p5, %p1756_p3 }
  0x1b   : > { %1764 = shalt.err (!%p1761_p7)
}
  0x1c   : > { %s1765_s17 = scalar_lea.vmem %s1999_s30, 1024  ;;  %p1773_p2 = scmp.lt.s32.totalorder %s1999_s30, %s1999_s30 }
  0x1d   : > { %p1766_p9 = scmp.ne.s32.totalorder %s1999_s30, %s1765_s17  ;;  %p1774_p12 = scmp.lt.s32.totalorder %s1765_s17, %s1765_s17 }
  0x1f   : > { %p1768_p10 = pnand %p1766_p9, %p1754_p13  ;;  %p1775_p0 = por %p1774_p12, %p1773_p2 }
  0x21   : > { %p1769_p1 = pneg %p1768_p10 }
  0x23   : > { %p1776_p6 = pnand %p1775_p0, %p1769_p1 }
  0x25   : > { %1779 = shalt.err (!%p1776_p6)
}
  0x26   : > { %s1912_s18 = smov 64   ;;  %s1913_s19 = smov 4  }
  0x27   : > { %1678 = dma.hbm_to_vmem [thread:$0]  (!%p2006_p11), %s2466_s2, 1024, %s1999_s30, [#allocation7], %s1912_s18, %s1912_s18, %s1913_s19  }
  0x28   : > { %s1780_s10 = scalar_lea.hbm %s2468_s4, 1024 }
  0x29   : > { %p1781_p2 = scmp.ne.s32.totalorder %s2468_s4, %s1780_s10  ;;  %p1787_p10 = scmp.lt.u32.totalorder %s1780_s10, %s2468_s4 }
  0x2b   : > { %p1783_p1 = pnand %p1781_p2, %p1754_p13 }
  0x2d   : > { %p1784_p6 = pneg %p1783_p1 }
  0x2f   : > { %p1789_p3 = pnand %p1787_p10, %p1784_p6 }
  0x31   : > { %1792 = shalt.err (!%p1789_p3)
}
  0x32   : > { %s1793_s30 = scalar_lea.vmem %s2010_s9, 1024  ;;  %p1801_p12 = scmp.lt.s32.totalorder %s2010_s9, %s2010_s9 }
  0x33   : > { %p1794_p5 = scmp.ne.s32.totalorder %s2010_s9, %s1793_s30  ;;  %p1802_p0 = scmp.lt.s32.totalorder %s1793_s30, %s1793_s30 }
  0x35   : > { %p1796_p7 = pnand %p1794_p5, %p1754_p13  ;;  %p1803_p2 = por %p1802_p0, %p1801_p12 }
  0x37   : > { %p1797_p9 = pneg %p1796_p7 }
  0x39   : > { %p1804_p1 = pnand %p1803_p2, %p1797_p9 }
  0x3b   : > { %1807 = shalt.err (!%p1804_p1)
}
  0x3c   : > { %1681 = dma.hbm_to_vmem [thread:$0]  (!%p2006_p11), %s2468_s4, 1024, %s2010_s9, [#allocation7], %s1912_s18, %s1912_s18, %s1913_s19  }
  0x3d   : > { %s2065_s17 = sadd.s32 1, %s1908_s23   ;;  %s52_s7 = sadd.s32 1, %s1904_s22 }
  0x3e   : > { %s49_s20 = ssub.s32 %s1908_s23, %s2065_s17  ;;  %p59_p13 = scmp.ne.s32.totalorder %s1904_s22, %s1900_s21 }
  0x3f   : > { %p50_p6 = scmp.eq.s32.totalorder %s49_s20, 0  ;;  %p60_p10 = scmp.eq.s32.totalorder %s1908_s23, 0 }
  0x40   : > { %p2478_p3 = scmp.eq.s32.totalorder %s1976_s24, 1  ;;  %p1692_p7 = scmp.lt.s32.totalorder %s1908_s23, 2 }
  0x41   : > { %s2081_s29 = scalar_select %p50_p6, %s1904_s22, %s52_s7  }
  0x42   : > { %p2075_p5 = por %p2478_p3, %p59_p13  ;;  %p61_p9 = por %p60_p10, %p59_p13 }
  0x43   : > { %s234_s8 = sand.u32 1, %s1904_s22   ;;  %s1421_s9 = sshll.u32 %s1908_s23, 13 }
  0x44   : > { %s2479_s25 = scalar_select %p2075_p5, 1, 0 }
  0x45   : > { %s1390_s10 = sshll.u32 %s234_s8, 9  ;;  %s2088_s11 = scalar_lea.hbm %s2465_s1, %s1421_s9 }
  0x46   : > { %s238_s12 = scalar_lea.vmem [#allocation3], %s1390_s10  ;;  %p2092_p11 = pnand %p1692_p7, %p61_p9 }
  0x47   : > { %s245_s13 = sshll.u32 %s238_s12, 4  ;;  %s2096_s30 = scalar_lea.sflag [#allocation4], %s234_s8  ;;  %s2090_s13 = int_to_ptr.vmem [resolvable:$true] %s245_s13 }
  0x48   : > { %s1808_s15 = scalar_lea.hbm %s2088_s11, 8192  ;;  %p1810_p0 = pneg %p2092_p11 }
  0x49   : > { %p1809_p12 = scmp.ne.s32.totalorder %s2088_s11, %s1808_s15  ;;  %s1813_s20 = scalar_lea.hbm %s2465_s1, 16384 }
  0x4a   : > { %p1814_p13 = scmp.lt.u32.totalorder %s2088_s11, %s2465_s1  ;;  %p1815_p6 = scmp.lt.u32.totalorder %s1813_s20, %s1808_s15 }
  0x4b   : > { %p1811_p2 = pnand %p1810_p0, %p1809_p12  ;;  %p1817_p3 = scmp.lt.u32.totalorder %s1808_s15, %s2088_s11 }
  0x4c   : > { %p1816_p10 = por %p1815_p6, %p1814_p13 }
  0x4d   : > { %p1812_p1 = pneg %p1811_p2 }
  0x4e   : > { %p1818_p7 = por %p1817_p3, %p1816_p10 }
  0x50   : > { %p1819_p9 = pnand %p1818_p7, %p1812_p1 }
  0x52   : > { %1822 = shalt.err (!%p1819_p9)
}
  0x53   : > { %s1823_s8 = scalar_lea.vmem %s2090_s13, 8192  ;;  %s1914_s18 = smov [#allocation3]  }
  0x54   : > { %p1824_p12 = scmp.ne.s32.totalorder %s2090_s13, %s1823_s8  ;;  %s1828_s19 = sshll.u32 %s1914_s18, 4  ;;  %s1829_s19 = int_to_ptr.vmem [resolvable:$false] %s1828_s19 }
  0x55   : > { %s1830_s12 = scalar_lea.vmem %s1829_s19, 16384  ;;  %p1831_p4 = scmp.lt.s32.totalorder %s2090_s13, %s1829_s19 }
  0x56   : > { %p1826_p2 = pnand %p1824_p12, %p1810_p0  ;;  %p1832_p13 = scmp.lt.s32.totalorder %s1830_s12, %s1823_s8 }
  0x58   : > { %p1827_p5 = pneg %p1826_p2  ;;  %p1833_p6 = por %p1832_p13, %p1831_p4 }
  0x5a   : > { %p1834_p10 = pnand %p1833_p6, %p1827_p5 }
  0x5c   : > { %1837 = shalt.err (!%p1834_p10)
}
  0x5d   : > { %s1915_s15 = smov 128   ;;  %s1916_s16 = smov 8  }
  0x5e   : > { %1685 = dma.hbm_to_vmem [thread:$0]  (!%p2092_p11), %s2088_s11, 8192, %s2090_s13, %s2096_s30, %s1915_s15, %s1915_s15, %s1916_s16  }
  0x5f   : > { %257 = sbr.rel (%p1995_p8) target bundleno = 713 (0x2c9), region = 44  ;;  %s2127_s7 = sand.u32 (!%p1995_p8), 1, %s1900_s21  }
  0x60   : > { %s1394_s20 = sshll.u32 (!%p1995_p8), %s2127_s7, 9  ;;  %s260_s10 = scalar_lea.sflag (!%p1995_p8), [#allocation4], %s2127_s7 }
  0x61   : > { %s2133_s9 = scalar_lea.vmem (!%p1995_p8), [#allocation3], %s1394_s20  ;;  %p2481_p4 = scmp.ne.s32.totalorder (!%p1995_p8), %s2474_s26, 0 }
  0x66   : > { %1883 = dma.done.wait (%p2481_p4), %s260_s10, 8192  }
  0x67   : > { %1885 = vsyncadd (%p2481_p4), %s260_s10, 4294959104  ;;  %p2482_p5 = scmp.eq.s32.totalorder %s1976_s24, 0 }
  0x69   : > { %1887 = dma.done.wait (%p2482_p5), [#allocation7], 2048   ;;  %p2483_p8 = pmov %p2482_p5 }
  0x6a   : > { %v1736_v0 = vld [vmem:[#allocation6] sm:$0xff]   ;;  %v1737_v1 = vld [vmem:[#allocation6 + $0x8] sm:$0xff]   ;;  %v1738_v2 = vld [vmem:[#allocation6 + $0x10] sm:$0xff]   ;;  %s2285_s14 = scalar_lea.vmem [#allocation9], %s1394_s20  ;;  %s1422_s30 = sshll.u32 %s1976_s24, 13 }
  0x6b   : > { %1889 = vsyncadd (%p2483_p8), [#allocation7], 4294965248  ;;  %1503 = vmatprep.subr.bf16.mxu0 %v1736_v0  ;;  %v1739_v3 = vld [vmem:[#allocation6 + $0x18] sm:$0xff]   ;;  %v303_v4 = vld [vmem:[%s2133_s9] sm:$0xff]  ;;  %s1293_s8 = sshll.u32 %s2285_s14, 4  ;;  %s2414_s12 = scalar_lea.hbm %s2470_s6, %s1422_s30  ;;  %s2416_s8 = int_to_ptr.vmem [resolvable:$true] %s1293_s8 }
  0x6c   : > { %1504 = vmatpush3.bf16.msra.mxu0 %v1736_v0  ;;  %v304_v5 = vld [vmem:[%s2133_s9 + $0x8] sm:$0xff]  ;;  %v1740_v7 = vld [vmem:[#allocation6 + $0x20] sm:$0xff]   ;;  %v1742_v9 = vld [vmem:[#allocation6 + $0x30] sm:$0xff]   ;;  %s1280_s24 = scalar_lea.sflag [#allocation5], %s2127_s7  ;;  %s1838_s15 = scalar_lea.vmem %s2416_s8, 8192 }
  0x6d   : > { %1505 = vmatprep.subr.bf16.mxu0 %v1737_v1  ;;  %v367_v6 = vpack.c.bf16 %v304_v5, %v303_v4  ;;  %v1741_v8 = vld [vmem:[#allocation6 + $0x28] sm:$0xff]   ;;  %v1743_v10 = vld [vmem:[#allocation6 + $0x38] sm:$0xff]   ;;  %v305_v11 = vld [vmem:[%s2133_s9 + $0x10] sm:$0xff]  ;;  %p1839_p11 = scmp.ne.s32.totalorder %s2416_s8, %s1838_s15  ;;  %p2484_p0 = scmp.ne.s32.totalorder %s2479_s25, 0 }
  0x6e   : > { %v306_v12 = vld [vmem:[%s2133_s9 + $0x18] sm:$0xff]  ;;  %v307_v13 = vld [vmem:[%s2133_s9 + $0x20] sm:$0xff]  ;;  %v308_v14 = vld [vmem:[%s2133_s9 + $0x28] sm:$0xff]  ;;  %s1917_s16 = smov [#allocation9]  }
  0x6f   : > { %1519 = vmatprep.mubr.bf16.mxu0 %v367_v6  ;;  %v368_v15 = vpack.c.bf16 %v306_v12, %v305_v11  ;;  %v1744_v16 = vld [vmem:[#allocation8] sm:$0xff]   ;;  %v369_v17 = vpack.c.bf16 %v308_v14, %v307_v13  ;;  %v1745_v18 = vld [vmem:[#allocation8 + $0x8] sm:$0xff]   ;;  %v309_v19 = vld [vmem:[%s2133_s9 + $0x30] sm:$0xff]  ;;  %p1840_p1 = pnand %p1839_p11, %p2484_p0  ;;  %s1842_s20 = sshll.u32 %s1917_s16, 4  ;;  %s1843_s20 = int_to_ptr.vmem [resolvable:$false] %s1842_s20 }
  0x70   : > { %1506 = vmatpush3.bf16.msra.mxu0 %v1737_v1  ;;  %1583 = vmatprep.subr.bf16.mxu1 %v1744_v16  ;;  %v310_v20 = vld [vmem:[%s2133_s9 + $0x38] sm:$0xff]  ;;  %v1746_v21 = vld [vmem:[#allocation8 + $0x10] sm:$0xff]   ;;  %v311_v22 = vld [vmem:[%s2133_s9 + $0x40] sm:$0xff]  ;;  %s1844_s10 = scalar_lea.vmem %s1843_s20, 16384  ;;  %p1845_p7 = scmp.lt.s32.totalorder %s2416_s8, %s1843_s20 }
  0x71   : > { %1507 = vmatprep.subr.bf16.mxu0 %v1738_v2  ;;  %1584 = vmatpush3.bf16.msra.mxu1 %v1744_v16  ;;  %v312_v23 = vld [vmem:[%s2133_s9 + $0x48] sm:$0xff]  ;;  %v370_v24 = vpack.c.bf16 %v310_v20, %v309_v19  ;;  %v1747_v25 = vld [vmem:[#allocation8 + $0x18] sm:$0xff]   ;;  %v1748_v27 = vld [vmem:[#allocation8 + $0x20] sm:$0xff]   ;;  %p1841_p3 = pneg %p1840_p1  ;;  %p1846_p9 = scmp.lt.s32.totalorder %s1844_s10, %s1838_s15 }
  0x72   : > { %1585 = vmatprep.subr.bf16.mxu1 %v1745_v18  ;;  %v371_v26 = vpack.c.bf16 %v312_v23, %v311_v22  ;;  %v313_v28 = vld [vmem:[%s2133_s9 + $0x50] sm:$0xff]  ;;  %v314_v29 = vld [vmem:[%s2133_s9 + $0x58] sm:$0xff]  ;;  %v315_v30 = vld [vmem:[%s2133_s9 + $0x60] sm:$0xff] }
  0x73   : > { %v316_v31 = vld [vmem:[%s2133_s9 + $0x68] sm:$0xff]  ;;  %v372_v32 = vpack.c.bf16 %v314_v29, %v313_v28  ;;  %v317_v35 = vld [vmem:[%s2133_s9 + $0x70] sm:$0xff]  ;;  %v318_v36 = vld [vmem:[%s2133_s9 + $0x78] sm:$0xff]  ;;  %p1847_p12 = por %p1846_p9, %p1845_p7 }
  0x74   : > { %1508 = vmatpush3.bf16.msra.mxu0 %v1738_v2  ;;  %v1749_v33 = vld [vmem:[#allocation8 + $0x28] sm:$0xff]   ;;  %v373_v34 = vpack.c.bf16 %v316_v31, %v315_v30  ;;  %v319_v37 = vld [vmem:[%s2133_s9 + $0x80] sm:$0xff]  ;;  %v374_v39 = vpack.c.bf16 %v318_v36, %v317_v35  ;;  %v321_v41 = vld [vmem:[%s2133_s9 + $0x90] sm:$0xff] }
  0x75   : > { %1509 = vmatprep.subr.bf16.mxu0 %v1739_v3  ;;  %1586 = vmatpush3.bf16.msra.mxu1 %v1745_v18  ;;  %v320_v38 = vld [vmem:[%s2133_s9 + $0x88] sm:$0xff]  ;;  %v322_v42 = vld [vmem:[%s2133_s9 + $0x98] sm:$0xff]  ;;  %v323_v43 = vld [vmem:[%s2133_s9 + $0xa0] sm:$0xff]  ;;  %p1848_p2 = pnand %p1847_p12, %p1841_p3 }
  0x76   : > { %1587 = vmatprep.subr.bf16.mxu1 %v1746_v21  ;;  %v375_v40 = vpack.c.bf16 %v320_v38, %v319_v37  ;;  %v324_v44 = vld [vmem:[%s2133_s9 + $0xa8] sm:$0xff]  ;;  %v376_v45 = vpack.c.bf16 %v322_v42, %v321_v41  ;;  %v325_v47 = vld [vmem:[%s2133_s9 + $0xb0] sm:$0xff]  ;;  %v326_v48 = vld [vmem:[%s2133_s9 + $0xb8] sm:$0xff] }
  0x77   : > { %v377_v46 = vpack.c.bf16 %v324_v44, %v323_v43  ;;  %v327_v49 = vld [vmem:[%s2133_s9 + $0xc0] sm:$0xff]  ;;  %v328_v50 = vld [vmem:[%s2133_s9 + $0xc8] sm:$0xff]  ;;  %v378_v51 = vpack.c.bf16 %v326_v48, %v325_v47  ;;  %v329_v53 = vld [vmem:[%s2133_s9 + $0xd0] sm:$0xff] }
  0x78   : > { %1510 = vmatpush3.bf16.msra.mxu0 %v1739_v3  ;;  %v379_v52 = vpack.c.bf16 %v328_v50, %v327_v49  ;;  %v330_v54 = vld [vmem:[%s2133_s9 + $0xd8] sm:$0xff]  ;;  %v331_v55 = vld [vmem:[%s2133_s9 + $0xe0] sm:$0xff]  ;;  %v332_v56 = vld [vmem:[%s2133_s9 + $0xe8] sm:$0xff] }
  0x79   : > { %1511 = vmatprep.subr.bf16.mxu0 %v1740_v7  ;;  %1588 = vmatpush3.bf16.msra.mxu1 %v1746_v21  ;;  %v380_v57 = vpack.c.bf16 %v330_v54, %v329_v53  ;;  %v381_v58 = vpack.c.bf16 %v332_v56, %v331_v55  ;;  %v333_v59 = vld [vmem:[%s2133_s9 + $0xf0] sm:$0xff]  ;;  %v334_v60 = vld [vmem:[%s2133_s9 + $0xf8] sm:$0xff]  ;;  %v335_v61 = vld [vmem:[%s2133_s9 + $0x100] sm:$0xff] }
  0x7a   : > { %1589 = vmatprep.subr.bf16.mxu1 %v1747_v25  ;;  %v336_v62 = vld [vmem:[%s2133_s9 + $0x108] sm:$0xff]  ;;  %v382_v63 = vpack.c.bf16 %v334_v60, %v333_v59  ;;  %v337_v1 = vld [vmem:[%s2133_s9 + $0x110] sm:$0xff]  ;;  %v338_v2 = vld [vmem:[%s2133_s9 + $0x118] sm:$0xff] }
  0x7b   : > { %v383_v0 = vpack.c.bf16 %v336_v62, %v335_v61  ;;  %v339_v3 = vld [vmem:[%s2133_s9 + $0x120] sm:$0xff]  ;;  %v340_v4 = vld [vmem:[%s2133_s9 + $0x128] sm:$0xff]  ;;  %v384_v5 = vpack.c.bf16 %v338_v2, %v337_v1  ;;  %v345_v13 = vld [vmem:[%s2133_s9 + $0x150] sm:$0xff] }
  0x7c   : > { %1512 = vmatpush3.bf16.msra.mxu0 %v1740_v7  ;;  %v385_v6 = vpack.c.bf16 %v340_v4, %v339_v3  ;;  %v341_v7 = vld [vmem:[%s2133_s9 + $0x130] sm:$0xff]  ;;  %v346_v14 = vld [vmem:[%s2133_s9 + $0x158] sm:$0xff]  ;;  %v348_v16 = vld [vmem:[%s2133_s9 + $0x168] sm:$0xff] }
  0x7d   : > { %1513 = vmatprep.subr.bf16.mxu0 %v1741_v8  ;;  %1590 = vmatpush3.bf16.msra.mxu1 %v1747_v25  ;;  %v349_v19 = vld [vmem:[%s2133_s9 + $0x170] sm:$0xff]  ;;  %v350_v20 = vld [vmem:[%s2133_s9 + $0x178] sm:$0xff]  ;;  %v351_v21 = vld [vmem:[%s2133_s9 + $0x180] sm:$0xff] }
  0x7e   : > { %1591 = vmatprep.subr.bf16.mxu1 %v1748_v27  ;;  %v352_v22 = vld [vmem:[%s2133_s9 + $0x188] sm:$0xff]  ;;  %v390_v23 = vpack.c.bf16 %v350_v20, %v349_v19  ;;  %v354_v28 = vld [vmem:[%s2133_s9 + $0x198] sm:$0xff]  ;;  %v355_v29 = vld [vmem:[%s2133_s9 + $0x1a0] sm:$0xff] }
  0x7f   : > { %v391_v25 = vpack.c.bf16 %v352_v22, %v351_v21  ;;  %v356_v30 = vld [vmem:[%s2133_s9 + $0x1a8] sm:$0xff]  ;;  %v359_v35 = vld [vmem:[%s2133_s9 + $0x1c0] sm:$0xff] }
  0x80   : > { %1514 = vmatpush3.bf16.msra.mxu0 %v1741_v8  ;;  %v342_v8 = vld [vmem:[%s2133_s9 + $0x138] sm:$0xff]  ;;  %v360_v36 = vld [vmem:[%s2133_s9 + $0x1c8] sm:$0xff]  ;;  %v363_v41 = vld [vmem:[%s2133_s9 + $0x1e0] sm:$0xff] }
  0x81   : > { %1515 = vmatprep.subr.bf16.mxu0 %v1742_v9  ;;  %1592 = vmatpush3.bf16.msra.mxu1 %v1748_v27  ;;  %v386_v11 = vpack.c.bf16 %v342_v8, %v341_v7  ;;  %v353_v27 = vld [vmem:[%s2133_s9 + $0x190] sm:$0xff]  ;;  %v395_v38 = vpack.c.bf16 %v360_v36, %v359_v35  ;;  %v364_v42 = vld [vmem:[%s2133_s9 + $0x1e8] sm:$0xff]  ;;  %v2210_v48 = vld [vmem:[%s2467_s3] ss:$0 sm:$0xff] }
  0x82   : > { %1593 = vmatprep.subr.bf16.mxu1 %v1749_v33  ;;  %v392_v31 = vpack.c.bf16 %v354_v28, %v353_v27  ;;  %v397_v44 = vpack.c.bf16 %v364_v42, %v363_v41 }
  0x84   : > { %1516 = vmatpush3.bf16.msra.mxu0 %v1742_v9  ;;  %v343_v9 = vld [vmem:[%s2133_s9 + $0x140] sm:$0xff] }
  0x85   : > { %1517 = vmatprep.subr.bf16.mxu0 %v1743_v10  ;;  %1594 = vmatpush3.bf16.msra.mxu1 %v1749_v33  ;;  %v357_v33 = vld [vmem:[%s2133_s9 + $0x1b0] sm:$0xff] }
  0x88   : > { %1518 = vmatpush3.bf16.msra.mxu0 %v1743_v10  ;;  %v344_v10 = vld [vmem:[%s2133_s9 + $0x148] sm:$0xff] }
  0x89   : > { %v387_v12 = vpack.c.bf16 %v344_v10, %v343_v9 }
  0x8b   : > { %1520 = vmatmul.mubr.bf16.vlgmr.msra.gmra.mrb[0].mxu0 %v368_v15  ;;  %v347_v15 = vld [vmem:[%s2133_s9 + $0x160] sm:$0xff] }
  0x8c   : > { %1523 = vmatprep.mubr.bf16.mxu0 %v369_v17  ;;  %v388_v17 = vpack.c.bf16 %v346_v14, %v345_v13  ;;  %v389_v18 = vpack.c.bf16 %v348_v16, %v347_v15 }
  0x93   : > { %1524 = vmatmul.mubr.bf16.gmra.mrb[4].mxu0 %v370_v24  ;;  %v1750_v24 = vld [vmem:[#allocation8 + $0x30] sm:$0xff]  }
  0x94   : > { %1527 = vmatprep.mubr.bf16.mxu0 %v371_v26  ;;  %1595 = vmatprep.subr.bf16.mxu1 %v1750_v24  ;;  %v1751_v26 = vld [vmem:[#allocation8 + $0x38] sm:$0xff]  }
  0x95   : > { %1596 = vmatpush3.bf16.msra.mxu1 %v1750_v24 }
  0x96   : > { %1597 = vmatprep.subr.bf16.mxu1 %v1751_v26 }
  0x99   : > { %1598 = vmatpush3.bf16.msra.mxu1 %v1751_v26 }
  0x9b   : > { %1528 = vmatmul.mubr.bf16.gmra.mrb[8].mxu0 %v372_v32  ;;  %v393_v32 = vpack.c.bf16 %v356_v30, %v355_v29 }
  0x9c   : > { %1531 = vmatprep.mubr.bf16.mxu0 %v373_v34  ;;  %v358_v34 = vld [vmem:[%s2133_s9 + $0x1b8] sm:$0xff] }
  0x9d   : > { %v394_v37 = vpack.c.bf16 %v358_v34, %v357_v33 }
  0xa3   : > { %1532 = vmatmul.mubr.bf16.gmra.mrb[12].mxu0 %v374_v39  ;;  %v361_v39 = vld [vmem:[%s2133_s9 + $0x1d0] sm:$0xff] }
  0xa4   : > { %1535 = vmatprep.mubr.bf16.mxu0 %v375_v40  ;;  %v362_v40 = vld [vmem:[%s2133_s9 + $0x1d8] sm:$0xff] }
  0xa5   : > { %v396_v43 = vpack.c.bf16 %v362_v40, %v361_v39 }
  0xab   : > { %1536 = vmatmul.mubr.bf16.gmra.mrb[16].mxu0 %v376_v45  ;;  %v365_v45 = vld [vmem:[%s2133_s9 + $0x1f0] sm:$0xff] }
  0xac   : > { %1539 = vmatprep.mubr.bf16.mxu0 %v377_v46  ;;  %v366_v46 = vld [vmem:[%s2133_s9 + $0x1f8] sm:$0xff] }
  0xad   : > { %v398_v47 = vpack.c.bf16 %v366_v46, %v365_v45 }
  0xb3   : > { %1540 = vmatmul.mubr.bf16.gmra.mrb[20].mxu0 %v378_v51 }
  0xb4   : > { %1543 = vmatprep.mubr.bf16.mxu0 %v379_v52 }
  0xbb   : > { %1544 = vmatmul.mubr.bf16.gmra.mrb[24].mxu0 %v380_v57 }
  0xbc   : > { %1547 = vmatprep.mubr.bf16.mxu0 %v381_v58 }
  0xc3   : > { %1548 = vmatmul.mubr.bf16.gmra.mrb[28].mxu0 %v382_v63 }
  0xc4   : > { %1551 = vmatprep.mubr.bf16.mxu0 %v383_v0 }
  0xcb   : > { %1552 = vmatmul.mubr.bf16.gmra.mrb[32].mxu0 %v384_v5 }
  0xcc   : > { %1555 = vmatprep.mubr.bf16.mxu0 %v385_v6 }
  0xd3   : > { %1556 = vmatmul.mubr.bf16.gmra.mrb[36].mxu0 %v386_v11 }
  0xd4   : > { %1559 = vmatprep.mubr.bf16.mxu0 %v387_v12 }
  0xdb   : > { %1560 = vmatmul.mubr.bf16.gmra.mrb[40].mxu0 %v388_v17 }
  0xdc   : > { %1563 = vmatprep.mubr.bf16.mxu0 %v389_v18 }
  0xe3   : > { %1564 = vmatmul.mubr.bf16.gmra.mrb[44].mxu0 %v390_v23 }
  0xe4   : > { %1567 = vmatprep.mubr.bf16.mxu0 %v391_v25 }
  0xeb   : > { %1568 = vmatmul.mubr.bf16.gmra.mrb[48].mxu0 %v392_v31 }
  0xec   : > { %1571 = vmatprep.mubr.bf16.mxu0 %v393_v32 }
  0xf3   : > { %1572 = vmatmul.mubr.bf16.gmra.mrb[52].mxu0 %v394_v37 }
  0xf4   : > { %1575 = vmatprep.mubr.bf16.mxu0 %v395_v38 }
  0xfb   : > { %1576 = vmatmul.mubr.bf16.gmra.mrb[56].mxu0 %v396_v43 }
  0xfc   : > { %1579 = vmatprep.mubr.bf16.mxu0 %v397_v44 }
 0x103   : > { %1580 = vmatmul.mubr.bf16.gmra.mrb[60].mxu0 %v398_v47 }
 0x15e   : > { %v1521_v49 = vpop.f32.mrb[0].mxu0 }
 0x15f   : > { %v513_v50 = vadd.f32 %v1521_v49, %v2210_v48  ;;  %v504_v51 = vpop.f32.mrb[1].mxu0 }
 0x160   : > { %v505_v52 = vadd.f32 %v2210_v48, %v504_v51  ;;  %v1522_v53 = vpop.f32.mrb[2].mxu0 }
 0x161   : > { %v516_v54 = vadd.f32 %v1522_v53, %v2210_v48  ;;  %v507_v55 = vpop.f32.mrb[3].mxu0  ;;  %v761_v57 = vmax.f32 %v513_v50, 0.0 }
 0x162   : > { %v508_v56 = vadd.f32 %v2210_v48, %v507_v55  ;;  %v759_v59 = vmax.f32 %v505_v52, 0.0 }
 0x163   : > { %v762_v58 = vmax.f32 %v516_v54, 0.0 }
 0x164   : > { %v760_v60 = vmax.f32 %v508_v56, 0.0 }
 0x165   : > { %v824_v61 = vpack.c.bf16 %v762_v58, %v761_v57 }
 0x166   : > { %v1525_v62 = vpop.f32.mrb[4].mxu0  ;;  %v823_v63 = vpack.c.bf16 %v760_v60, %v759_v59 }
 0x167   : > { %v529_v0 = vadd.f32 %v1525_v62, %v2210_v48  ;;  %v520_v1 = vpop.f32.mrb[5].mxu0 }
 0x168   : > { %v521_v2 = vadd.f32 %v2210_v48, %v520_v1  ;;  %v1526_v3 = vpop.f32.mrb[6].mxu0  ;;  %1599 = vmatprep.mubr.bf16.mxu1 %v823_v63 }
 0x169   : > { %v532_v4 = vadd.f32 %v1526_v3, %v2210_v48  ;;  %v523_v5 = vpop.f32.mrb[7].mxu0  ;;  %1600 = vmatmul.mubr.bf16.vlgmr.msra.gmra.mrb[0].mxu1 %v824_v61  ;;  %v765_v7 = vmax.f32 %v529_v0, 0.0 }
 0x16a   : > { %v524_v6 = vadd.f32 %v2210_v48, %v523_v5  ;;  %v763_v9 = vmax.f32 %v521_v2, 0.0 }
 0x16b   : > { %v766_v8 = vmax.f32 %v532_v4, 0.0 }
 0x16c   : > { %v764_v10 = vmax.f32 %v524_v6, 0.0 }
 0x16d   : > { %v826_v11 = vpack.c.bf16 %v766_v8, %v765_v7 }
 0x16e   : > { %v825_v12 = vpack.c.bf16 %v764_v10, %v763_v9  ;;  %v1529_v13 = vpop.f32.mrb[8].mxu0 }
 0x16f   : > { %v545_v14 = vadd.f32 %v1529_v13, %v2210_v48  ;;  %v536_v15 = vpop.f32.mrb[9].mxu0 }
 0x170   : > { %v537_v16 = vadd.f32 %v2210_v48, %v536_v15  ;;  %v1530_v17 = vpop.f32.mrb[10].mxu0  ;;  %1603 = vmatprep.mubr.bf16.mxu1 %v825_v12 }
 0x171   : > { %v548_v18 = vadd.f32 %v1530_v17, %v2210_v48  ;;  %v539_v19 = vpop.f32.mrb[11].mxu0  ;;  %1604 = vmatmul.mubr.bf16.gmra.mrb[4].mxu1 %v826_v11  ;;  %v769_v21 = vmax.f32 %v545_v14, 0.0 }
 0x172   : > { %v540_v20 = vadd.f32 %v2210_v48, %v539_v19  ;;  %v767_v23 = vmax.f32 %v537_v16, 0.0 }
 0x173   : > { %v770_v22 = vmax.f32 %v548_v18, 0.0 }
 0x174   : > { %v768_v24 = vmax.f32 %v540_v20, 0.0 }
 0x175   : > { %v828_v25 = vpack.c.bf16 %v770_v22, %v769_v21 }
 0x176   : > { %v827_v26 = vpack.c.bf16 %v768_v24, %v767_v23  ;;  %v1533_v27 = vpop.f32.mrb[12].mxu0 }
 0x177   : > { %v561_v28 = vadd.f32 %v1533_v27, %v2210_v48  ;;  %v552_v29 = vpop.f32.mrb[13].mxu0 }
 0x178   : > { %v553_v30 = vadd.f32 %v2210_v48, %v552_v29  ;;  %v1534_v31 = vpop.f32.mrb[14].mxu0  ;;  %1607 = vmatprep.mubr.bf16.mxu1 %v827_v26 }
 0x179   : > { %v564_v32 = vadd.f32 %v1534_v31, %v2210_v48  ;;  %v555_v33 = vpop.f32.mrb[15].mxu0  ;;  %1608 = vmatmul.mubr.bf16.gmra.mrb[8].mxu1 %v828_v25  ;;  %v773_v35 = vmax.f32 %v561_v28, 0.0 }
 0x17a   : > { %v556_v34 = vadd.f32 %v2210_v48, %v555_v33  ;;  %v771_v37 = vmax.f32 %v553_v30, 0.0 }
 0x17b   : > { %v774_v36 = vmax.f32 %v564_v32, 0.0 }
 0x17c   : > { %v772_v38 = vmax.f32 %v556_v34, 0.0 }
 0x17d   : > { %v830_v39 = vpack.c.bf16 %v774_v36, %v773_v35 }
 0x17e   : > { %v829_v40 = vpack.c.bf16 %v772_v38, %v771_v37  ;;  %v1537_v41 = vpop.f32.mrb[16].mxu0 }
 0x17f   : > { %v577_v42 = vadd.f32 %v1537_v41, %v2210_v48  ;;  %v568_v43 = vpop.f32.mrb[17].mxu0 }
 0x180   : > { %v569_v44 = vadd.f32 %v2210_v48, %v568_v43  ;;  %v1538_v45 = vpop.f32.mrb[18].mxu0  ;;  %1611 = vmatprep.mubr.bf16.mxu1 %v829_v40 }
 0x181   : > { %v580_v46 = vadd.f32 %v1538_v45, %v2210_v48  ;;  %v571_v47 = vpop.f32.mrb[19].mxu0  ;;  %1612 = vmatmul.mubr.bf16.gmra.mrb[12].mxu1 %v830_v39  ;;  %v777_v50 = vmax.f32 %v577_v42, 0.0 }
 0x182   : > { %v572_v49 = vadd.f32 %v2210_v48, %v571_v47  ;;  %v775_v52 = vmax.f32 %v569_v44, 0.0 }
 0x183   : > { %v778_v51 = vmax.f32 %v580_v46, 0.0 }
 0x184   : > { %v776_v53 = vmax.f32 %v572_v49, 0.0 }
 0x185   : > { %v832_v54 = vpack.c.bf16 %v778_v51, %v777_v50 }
 0x186   : > { %v831_v55 = vpack.c.bf16 %v776_v53, %v775_v52  ;;  %v1541_v56 = vpop.f32.mrb[20].mxu0 }
 0x187   : > { %v593_v57 = vadd.f32 %v1541_v56, %v2210_v48  ;;  %v584_v58 = vpop.f32.mrb[21].mxu0 }
 0x188   : > { %v585_v59 = vadd.f32 %v2210_v48, %v584_v58  ;;  %v1542_v60 = vpop.f32.mrb[22].mxu0  ;;  %1615 = vmatprep.mubr.bf16.mxu1 %v831_v55 }
 0x189   : > { %v596_v61 = vadd.f32 %v1542_v60, %v2210_v48  ;;  %v587_v62 = vpop.f32.mrb[23].mxu0  ;;  %1616 = vmatmul.mubr.bf16.gmra.mrb[16].mxu1 %v832_v54  ;;  %v781_v0 = vmax.f32 %v593_v57, 0.0 }
 0x18a   : > { %v588_v63 = vadd.f32 %v2210_v48, %v587_v62  ;;  %v779_v2 = vmax.f32 %v585_v59, 0.0 }
 0x18b   : > { %v782_v1 = vmax.f32 %v596_v61, 0.0 }
 0x18c   : > { %v780_v3 = vmax.f32 %v588_v63, 0.0 }
 0x18d   : > { %v834_v4 = vpack.c.bf16 %v782_v1, %v781_v0 }
 0x18e   : > { %v833_v5 = vpack.c.bf16 %v780_v3, %v779_v2  ;;  %v1545_v6 = vpop.f32.mrb[24].mxu0 }
 0x18f   : > { %v609_v7 = vadd.f32 %v1545_v6, %v2210_v48  ;;  %v600_v8 = vpop.f32.mrb[25].mxu0 }
 0x190   : > { %v601_v9 = vadd.f32 %v2210_v48, %v600_v8  ;;  %v1546_v10 = vpop.f32.mrb[26].mxu0  ;;  %1619 = vmatprep.mubr.bf16.mxu1 %v833_v5 }
 0x191   : > { %v612_v11 = vadd.f32 %v1546_v10, %v2210_v48  ;;  %v603_v12 = vpop.f32.mrb[27].mxu0  ;;  %1620 = vmatmul.mubr.bf16.gmra.mrb[20].mxu1 %v834_v4  ;;  %v785_v14 = vmax.f32 %v609_v7, 0.0 }
 0x192   : > { %v604_v13 = vadd.f32 %v2210_v48, %v603_v12  ;;  %v783_v16 = vmax.f32 %v601_v9, 0.0 }
 0x193   : > { %v786_v15 = vmax.f32 %v612_v11, 0.0 }
 0x194   : > { %v784_v17 = vmax.f32 %v604_v13, 0.0 }
 0x195   : > { %v836_v18 = vpack.c.bf16 %v786_v15, %v785_v14 }
 0x196   : > { %v835_v19 = vpack.c.bf16 %v784_v17, %v783_v16  ;;  %v1549_v20 = vpop.f32.mrb[28].mxu0 }
 0x197   : > { %v625_v21 = vadd.f32 %v1549_v20, %v2210_v48  ;;  %v616_v22 = vpop.f32.mrb[29].mxu0 }
 0x198   : > { %v617_v23 = vadd.f32 %v2210_v48, %v616_v22  ;;  %v1550_v24 = vpop.f32.mrb[30].mxu0  ;;  %1623 = vmatprep.mubr.bf16.mxu1 %v835_v19 }
 0x199   : > { %v628_v25 = vadd.f32 %v1550_v24, %v2210_v48  ;;  %v619_v26 = vpop.f32.mrb[31].mxu0  ;;  %1624 = vmatmul.mubr.bf16.gmra.mrb[24].mxu1 %v836_v18  ;;  %v789_v28 = vmax.f32 %v625_v21, 0.0 }
 0x19a   : > { %v620_v27 = vadd.f32 %v2210_v48, %v619_v26  ;;  %v787_v30 = vmax.f32 %v617_v23, 0.0 }
 0x19b   : > { %v790_v29 = vmax.f32 %v628_v25, 0.0 }
 0x19c   : > { %v788_v31 = vmax.f32 %v620_v27, 0.0 }
 0x19d   : > { %v838_v32 = vpack.c.bf16 %v790_v29, %v789_v28 }
 0x19e   : > { %v837_v33 = vpack.c.bf16 %v788_v31, %v787_v30  ;;  %v1553_v34 = vpop.f32.mrb[32].mxu0 }
 0x19f   : > { %v641_v35 = vadd.f32 %v1553_v34, %v2210_v48  ;;  %v632_v36 = vpop.f32.mrb[33].mxu0 }
 0x1a0   : > { %v633_v37 = vadd.f32 %v2210_v48, %v632_v36  ;;  %v1554_v38 = vpop.f32.mrb[34].mxu0  ;;  %1627 = vmatprep.mubr.bf16.mxu1 %v837_v33 }
 0x1a1   : > { %v644_v39 = vadd.f32 %v1554_v38, %v2210_v48  ;;  %v635_v40 = vpop.f32.mrb[35].mxu0  ;;  %1628 = vmatmul.mubr.bf16.gmra.mrb[28].mxu1 %v838_v32  ;;  %v793_v42 = vmax.f32 %v641_v35, 0.0 }
 0x1a2   : > { %v636_v41 = vadd.f32 %v2210_v48, %v635_v40  ;;  %v791_v44 = vmax.f32 %v633_v37, 0.0 }
 0x1a3   : > { %v794_v43 = vmax.f32 %v644_v39, 0.0 }
 0x1a4   : > { %v792_v45 = vmax.f32 %v636_v41, 0.0 }
 0x1a5   : > { %v840_v46 = vpack.c.bf16 %v794_v43, %v793_v42 }
 0x1a6   : > { %v839_v47 = vpack.c.bf16 %v792_v45, %v791_v44  ;;  %v1557_v49 = vpop.f32.mrb[36].mxu0 }
 0x1a7   : > { %v657_v50 = vadd.f32 %v1557_v49, %v2210_v48  ;;  %v648_v51 = vpop.f32.mrb[37].mxu0 }
 0x1a8   : > { %v649_v52 = vadd.f32 %v2210_v48, %v648_v51  ;;  %v1558_v53 = vpop.f32.mrb[38].mxu0  ;;  %1631 = vmatprep.mubr.bf16.mxu1 %v839_v47 }
 0x1a9   : > { %v660_v54 = vadd.f32 %v1558_v53, %v2210_v48  ;;  %v651_v55 = vpop.f32.mrb[39].mxu0  ;;  %1632 = vmatmul.mubr.bf16.gmra.mrb[32].mxu1 %v840_v46  ;;  %v797_v57 = vmax.f32 %v657_v50, 0.0 }
 0x1aa   : > { %v652_v56 = vadd.f32 %v2210_v48, %v651_v55  ;;  %v795_v59 = vmax.f32 %v649_v52, 0.0 }
 0x1ab   : > { %v798_v58 = vmax.f32 %v660_v54, 0.0 }
 0x1ac   : > { %v796_v60 = vmax.f32 %v652_v56, 0.0 }
 0x1ad   : > { %v842_v61 = vpack.c.bf16 %v798_v58, %v797_v57 }
 0x1ae   : > { %v841_v62 = vpack.c.bf16 %v796_v60, %v795_v59  ;;  %v1561_v63 = vpop.f32.mrb[40].mxu0 }
 0x1af   : > { %v673_v0 = vadd.f32 %v1561_v63, %v2210_v48  ;;  %v664_v1 = vpop.f32.mrb[41].mxu0 }
 0x1b0   : > { %v665_v2 = vadd.f32 %v2210_v48, %v664_v1  ;;  %v1562_v3 = vpop.f32.mrb[42].mxu0  ;;  %1635 = vmatprep.mubr.bf16.mxu1 %v841_v62 }
 0x1b1   : > { %v676_v4 = vadd.f32 %v1562_v3, %v2210_v48  ;;  %v667_v5 = vpop.f32.mrb[43].mxu0  ;;  %1636 = vmatmul.mubr.bf16.gmra.mrb[36].mxu1 %v842_v61  ;;  %v801_v7 = vmax.f32 %v673_v0, 0.0 }
 0x1b2   : > { %v668_v6 = vadd.f32 %v2210_v48, %v667_v5  ;;  %v799_v9 = vmax.f32 %v665_v2, 0.0 }
 0x1b3   : > { %v802_v8 = vmax.f32 %v676_v4, 0.0 }
 0x1b4   : > { %v800_v10 = vmax.f32 %v668_v6, 0.0 }
 0x1b5   : > { %v844_v11 = vpack.c.bf16 %v802_v8, %v801_v7 }
 0x1b6   : > { %v843_v12 = vpack.c.bf16 %v800_v10, %v799_v9  ;;  %v1565_v13 = vpop.f32.mrb[44].mxu0 }
 0x1b7   : > { %v689_v14 = vadd.f32 %v1565_v13, %v2210_v48  ;;  %v680_v15 = vpop.f32.mrb[45].mxu0 }
 0x1b8   : > { %v681_v16 = vadd.f32 %v2210_v48, %v680_v15  ;;  %v1566_v17 = vpop.f32.mrb[46].mxu0  ;;  %1639 = vmatprep.mubr.bf16.mxu1 %v843_v12 }
 0x1b9   : > { %v692_v18 = vadd.f32 %v1566_v17, %v2210_v48  ;;  %v683_v19 = vpop.f32.mrb[47].mxu0  ;;  %1640 = vmatmul.mubr.bf16.gmra.mrb[40].mxu1 %v844_v11  ;;  %v805_v21 = vmax.f32 %v689_v14, 0.0 }
 0x1ba   : > { %v684_v20 = vadd.f32 %v2210_v48, %v683_v19  ;;  %v803_v23 = vmax.f32 %v681_v16, 0.0 }
 0x1bb   : > { %v806_v22 = vmax.f32 %v692_v18, 0.0 }
 0x1bc   : > { %v804_v24 = vmax.f32 %v684_v20, 0.0  ;;  %v2279_v20 = vld [vmem:[%s2469_s5] ss:$0 sm:$0xff] }
 0x1bd   : > { %v846_v25 = vpack.c.bf16 %v806_v22, %v805_v21 }
 0x1be   : > { %v845_v26 = vpack.c.bf16 %v804_v24, %v803_v23  ;;  %v1569_v27 = vpop.f32.mrb[48].mxu0 }
 0x1bf   : > { %v705_v28 = vadd.f32 %v1569_v27, %v2210_v48  ;;  %v696_v29 = vpop.f32.mrb[49].mxu0 }
 0x1c0   : > { %v697_v30 = vadd.f32 %v2210_v48, %v696_v29  ;;  %v1570_v31 = vpop.f32.mrb[50].mxu0  ;;  %1643 = vmatprep.mubr.bf16.mxu1 %v845_v26 }
 0x1c1   : > { %v708_v32 = vadd.f32 %v1570_v31, %v2210_v48  ;;  %v699_v33 = vpop.f32.mrb[51].mxu0  ;;  %1644 = vmatmul.mubr.bf16.gmra.mrb[44].mxu1 %v846_v25  ;;  %v809_v35 = vmax.f32 %v705_v28, 0.0 }
 0x1c2   : > { %v700_v34 = vadd.f32 %v2210_v48, %v699_v33  ;;  %v807_v37 = vmax.f32 %v697_v30, 0.0 }
 0x1c3   : > { %v810_v36 = vmax.f32 %v708_v32, 0.0 }
 0x1c4   : > { %v808_v38 = vmax.f32 %v700_v34, 0.0 }
 0x1c5   : > { %v848_v39 = vpack.c.bf16 %v810_v36, %v809_v35 }
 0x1c6   : > { %v847_v40 = vpack.c.bf16 %v808_v38, %v807_v37  ;;  %v1573_v41 = vpop.f32.mrb[52].mxu0 }
 0x1c7   : > { %v721_v42 = vadd.f32 %v1573_v41, %v2210_v48  ;;  %v712_v43 = vpop.f32.mrb[53].mxu0 }
 0x1c8   : > { %v713_v44 = vadd.f32 %v2210_v48, %v712_v43  ;;  %v1574_v45 = vpop.f32.mrb[54].mxu0  ;;  %1647 = vmatprep.mubr.bf16.mxu1 %v847_v40 }
 0x1c9   : > { %v724_v46 = vadd.f32 %v1574_v45, %v2210_v48  ;;  %v715_v47 = vpop.f32.mrb[55].mxu0  ;;  %1648 = vmatmul.mubr.bf16.gmra.mrb[48].mxu1 %v848_v39  ;;  %v813_v50 = vmax.f32 %v721_v42, 0.0 }
 0x1ca   : > { %v716_v49 = vadd.f32 %v2210_v48, %v715_v47  ;;  %v811_v52 = vmax.f32 %v713_v44, 0.0 }
 0x1cb   : > { %v814_v51 = vmax.f32 %v724_v46, 0.0 }
 0x1cc   : > { %v812_v53 = vmax.f32 %v716_v49, 0.0 }
 0x1cd   : > { %v850_v54 = vpack.c.bf16 %v814_v51, %v813_v50 }
 0x1ce   : > { %v849_v55 = vpack.c.bf16 %v812_v53, %v811_v52  ;;  %v1577_v56 = vpop.f32.mrb[56].mxu0 }
 0x1cf   : > { %v737_v57 = vadd.f32 %v1577_v56, %v2210_v48  ;;  %v728_v58 = vpop.f32.mrb[57].mxu0 }
 0x1d0   : > { %v729_v59 = vadd.f32 %v2210_v48, %v728_v58  ;;  %v1578_v60 = vpop.f32.mrb[58].mxu0  ;;  %1651 = vmatprep.mubr.bf16.mxu1 %v849_v55 }
 0x1d1   : > { %v740_v61 = vadd.f32 %v1578_v60, %v2210_v48  ;;  %v731_v62 = vpop.f32.mrb[59].mxu0  ;;  %1652 = vmatmul.mubr.bf16.gmra.mrb[52].mxu1 %v850_v54  ;;  %v817_v0 = vmax.f32 %v737_v57, 0.0 }
 0x1d2   : > { %v732_v63 = vadd.f32 %v2210_v48, %v731_v62  ;;  %v815_v2 = vmax.f32 %v729_v59, 0.0 }
 0x1d3   : > { %v818_v1 = vmax.f32 %v740_v61, 0.0 }
 0x1d4   : > { %v816_v3 = vmax.f32 %v732_v63, 0.0 }
 0x1d5   : > { %v852_v4 = vpack.c.bf16 %v818_v1, %v817_v0 }
 0x1d6   : > { %v851_v5 = vpack.c.bf16 %v816_v3, %v815_v2  ;;  %v1581_v6 = vpop.f32.mrb[60].mxu0 }
 0x1d7   : > { %v753_v7 = vadd.f32 %v1581_v6, %v2210_v48  ;;  %v744_v8 = vpop.f32.mrb[61].mxu0 }
 0x1d8   : > { %v745_v9 = vadd.f32 %v2210_v48, %v744_v8  ;;  %v1582_v10 = vpop.f32.mrb[62].mxu0  ;;  %1655 = vmatprep.mubr.bf16.mxu1 %v851_v5 }
 0x1d9   : > { %v756_v11 = vadd.f32 %v1582_v10, %v2210_v48  ;;  %v747_v12 = vpop.f32.mrb[63].mxu0  ;;  %1656 = vmatmul.mubr.bf16.gmra.mrb[56].mxu1 %v852_v4  ;;  %v821_v14 = vmax.f32 %v753_v7, 0.0 }
 0x1da   : > { %v748_v13 = vadd.f32 %v2210_v48, %v747_v12  ;;  %v819_v16 = vmax.f32 %v745_v9, 0.0 }
 0x1db   : > { %v822_v15 = vmax.f32 %v756_v11, 0.0 }
 0x1dc   : > { %v820_v17 = vmax.f32 %v748_v13, 0.0 }
 0x1dd   : > { %v854_v18 = vpack.c.bf16 %v822_v15, %v821_v14 }
 0x1de   : > { %v853_v19 = vpack.c.bf16 %v820_v17, %v819_v16 }
 0x1e0   : > { %1659 = vmatprep.mubr.bf16.mxu1 %v853_v19 }
 0x1e1   : > { %1660 = vmatmul.mubr.bf16.gmra.mrb[60].mxu1 %v854_v18 }
 0x23c   : > { %v1601_v21 = vpop.f32.mrb[0].mxu1 }
 0x23d   : > { %v969_v22 = vadd.f32 %v1601_v21, %v2279_v20  ;;  %v960_v23 = vpop.f32.mrb[1].mxu1 }
 0x23e   : > { %v961_v24 = vadd.f32 %v2279_v20, %v960_v23  ;;  %v1602_v48 = vpop.f32.mrb[2].mxu1 }
 0x23f   : > { %1217 = vst [vmem:[%s2285_s14 + $0x10] sm:$0xff] %v969_v22  ;;  %v972_v25 = vadd.f32 %v1602_v48, %v2279_v20  ;;  %v963_v26 = vpop.f32.mrb[3].mxu1 }
 0x240   : > { %1215 = vst [vmem:[%s2285_s14] sm:$0xff] %v961_v24  ;;  %v964_v27 = vadd.f32 %v2279_v20, %v963_v26 }
 0x241   : > { %1218 = vst [vmem:[%s2285_s14 + $0x18] sm:$0xff] %v972_v25 }
 0x242   : > { %1216 = vst [vmem:[%s2285_s14 + $0x8] sm:$0xff] %v964_v27 }
 0x244   : > { %v1605_v28 = vpop.f32.mrb[4].mxu1 }
 0x245   : > { %v985_v29 = vadd.f32 %v1605_v28, %v2279_v20  ;;  %v976_v30 = vpop.f32.mrb[5].mxu1 }
 0x246   : > { %v977_v31 = vadd.f32 %v2279_v20, %v976_v30  ;;  %v1606_v32 = vpop.f32.mrb[6].mxu1 }
 0x247   : > { %1221 = vst [vmem:[%s2285_s14 + $0x30] sm:$0xff] %v985_v29  ;;  %v988_v33 = vadd.f32 %v1606_v32, %v2279_v20  ;;  %v979_v34 = vpop.f32.mrb[7].mxu1 }
 0x248   : > { %1219 = vst [vmem:[%s2285_s14 + $0x20] sm:$0xff] %v977_v31  ;;  %v980_v35 = vadd.f32 %v2279_v20, %v979_v34 }
 0x249   : > { %1222 = vst [vmem:[%s2285_s14 + $0x38] sm:$0xff] %v988_v33 }
 0x24a   : > { %1220 = vst [vmem:[%s2285_s14 + $0x28] sm:$0xff] %v980_v35 }
 0x24c   : > { %v1609_v36 = vpop.f32.mrb[8].mxu1 }
 0x24d   : > { %v1001_v37 = vadd.f32 %v1609_v36, %v2279_v20  ;;  %v992_v38 = vpop.f32.mrb[9].mxu1 }
 0x24e   : > { %v993_v39 = vadd.f32 %v2279_v20, %v992_v38  ;;  %v1610_v40 = vpop.f32.mrb[10].mxu1 }
 0x24f   : > { %1225 = vst [vmem:[%s2285_s14 + $0x50] sm:$0xff] %v1001_v37  ;;  %v1004_v41 = vadd.f32 %v1610_v40, %v2279_v20  ;;  %v995_v42 = vpop.f32.mrb[11].mxu1 }
 0x250   : > { %1223 = vst [vmem:[%s2285_s14 + $0x40] sm:$0xff] %v993_v39  ;;  %v996_v43 = vadd.f32 %v2279_v20, %v995_v42 }
 0x251   : > { %1226 = vst [vmem:[%s2285_s14 + $0x58] sm:$0xff] %v1004_v41 }
 0x252   : > { %1224 = vst [vmem:[%s2285_s14 + $0x48] sm:$0xff] %v996_v43 }
 0x254   : > { %v1613_v44 = vpop.f32.mrb[12].mxu1 }
 0x255   : > { %v1017_v45 = vadd.f32 %v1613_v44, %v2279_v20  ;;  %v1008_v46 = vpop.f32.mrb[13].mxu1 }
 0x256   : > { %v1009_v47 = vadd.f32 %v2279_v20, %v1008_v46  ;;  %v1614_v49 = vpop.f32.mrb[14].mxu1 }
 0x257   : > { %1229 = vst [vmem:[%s2285_s14 + $0x70] sm:$0xff] %v1017_v45  ;;  %v1020_v50 = vadd.f32 %v1614_v49, %v2279_v20  ;;  %v1011_v51 = vpop.f32.mrb[15].mxu1 }
 0x258   : > { %1227 = vst [vmem:[%s2285_s14 + $0x60] sm:$0xff] %v1009_v47  ;;  %v1012_v52 = vadd.f32 %v2279_v20, %v1011_v51 }
 0x259   : > { %1230 = vst [vmem:[%s2285_s14 + $0x78] sm:$0xff] %v1020_v50 }
 0x25a   : > { %1228 = vst [vmem:[%s2285_s14 + $0x68] sm:$0xff] %v1012_v52 }
 0x25c   : > { %v1617_v53 = vpop.f32.mrb[16].mxu1 }
 0x25d   : > { %v1033_v54 = vadd.f32 %v1617_v53, %v2279_v20  ;;  %v1024_v55 = vpop.f32.mrb[17].mxu1 }
 0x25e   : > { %v1025_v56 = vadd.f32 %v2279_v20, %v1024_v55  ;;  %v1618_v57 = vpop.f32.mrb[18].mxu1 }
 0x25f   : > { %1233 = vst [vmem:[%s2285_s14 + $0x90] sm:$0xff] %v1033_v54  ;;  %v1036_v58 = vadd.f32 %v1618_v57, %v2279_v20  ;;  %v1027_v59 = vpop.f32.mrb[19].mxu1 }
 0x260   : > { %1231 = vst [vmem:[%s2285_s14 + $0x80] sm:$0xff] %v1025_v56  ;;  %v1028_v60 = vadd.f32 %v2279_v20, %v1027_v59 }
 0x261   : > { %1234 = vst [vmem:[%s2285_s14 + $0x98] sm:$0xff] %v1036_v58 }
 0x262   : > { %1232 = vst [vmem:[%s2285_s14 + $0x88] sm:$0xff] %v1028_v60 }
 0x264   : > { %v1621_v61 = vpop.f32.mrb[20].mxu1 }
 0x265   : > { %v1049_v62 = vadd.f32 %v1621_v61, %v2279_v20  ;;  %v1040_v63 = vpop.f32.mrb[21].mxu1 }
 0x266   : > { %v1041_v0 = vadd.f32 %v2279_v20, %v1040_v63  ;;  %v1622_v1 = vpop.f32.mrb[22].mxu1 }
 0x267   : > { %1237 = vst [vmem:[%s2285_s14 + $0xb0] sm:$0xff] %v1049_v62  ;;  %v1052_v2 = vadd.f32 %v1622_v1, %v2279_v20  ;;  %v1043_v3 = vpop.f32.mrb[23].mxu1 }
 0x268   : > { %1235 = vst [vmem:[%s2285_s14 + $0xa0] sm:$0xff] %v1041_v0  ;;  %v1044_v4 = vadd.f32 %v2279_v20, %v1043_v3 }
 0x269   : > { %1238 = vst [vmem:[%s2285_s14 + $0xb8] sm:$0xff] %v1052_v2 }
 0x26a   : > { %1236 = vst [vmem:[%s2285_s14 + $0xa8] sm:$0xff] %v1044_v4 }
 0x26c   : > { %v1625_v5 = vpop.f32.mrb[24].mxu1 }
 0x26d   : > { %v1065_v6 = vadd.f32 %v1625_v5, %v2279_v20  ;;  %v1056_v7 = vpop.f32.mrb[25].mxu1 }
 0x26e   : > { %v1057_v8 = vadd.f32 %v2279_v20, %v1056_v7  ;;  %v1626_v9 = vpop.f32.mrb[26].mxu1 }
 0x26f   : > { %1241 = vst [vmem:[%s2285_s14 + $0xd0] sm:$0xff] %v1065_v6  ;;  %v1068_v10 = vadd.f32 %v1626_v9, %v2279_v20  ;;  %v1059_v11 = vpop.f32.mrb[27].mxu1 }
 0x270   : > { %1239 = vst [vmem:[%s2285_s14 + $0xc0] sm:$0xff] %v1057_v8  ;;  %v1060_v12 = vadd.f32 %v2279_v20, %v1059_v11 }
 0x271   : > { %1242 = vst [vmem:[%s2285_s14 + $0xd8] sm:$0xff] %v1068_v10 }
 0x272   : > { %1240 = vst [vmem:[%s2285_s14 + $0xc8] sm:$0xff] %v1060_v12 }
 0x274   : > { %v1629_v13 = vpop.f32.mrb[28].mxu1 }
 0x275   : > { %v1081_v14 = vadd.f32 %v1629_v13, %v2279_v20  ;;  %v1072_v15 = vpop.f32.mrb[29].mxu1 }
 0x276   : > { %v1073_v16 = vadd.f32 %v2279_v20, %v1072_v15  ;;  %v1630_v17 = vpop.f32.mrb[30].mxu1 }
 0x277   : > { %1245 = vst [vmem:[%s2285_s14 + $0xf0] sm:$0xff] %v1081_v14  ;;  %v1084_v18 = vadd.f32 %v1630_v17, %v2279_v20  ;;  %v1075_v19 = vpop.f32.mrb[31].mxu1 }
 0x278   : > { %1243 = vst [vmem:[%s2285_s14 + $0xe0] sm:$0xff] %v1073_v16  ;;  %v1076_v21 = vadd.f32 %v2279_v20, %v1075_v19 }
 0x279   : > { %1246 = vst [vmem:[%s2285_s14 + $0xf8] sm:$0xff] %v1084_v18 }
 0x27a   : > { %1244 = vst [vmem:[%s2285_s14 + $0xe8] sm:$0xff] %v1076_v21 }
 0x27c   : > { %v1633_v22 = vpop.f32.mrb[32].mxu1 }
 0x27d   : > { %v1097_v23 = vadd.f32 %v1633_v22, %v2279_v20  ;;  %v1088_v24 = vpop.f32.mrb[33].mxu1 }
 0x27e   : > { %v1089_v48 = vadd.f32 %v2279_v20, %v1088_v24  ;;  %v1634_v25 = vpop.f32.mrb[34].mxu1 }
 0x27f   : > { %1249 = vst [vmem:[%s2285_s14 + $0x110] sm:$0xff] %v1097_v23  ;;  %v1100_v26 = vadd.f32 %v1634_v25, %v2279_v20  ;;  %v1091_v27 = vpop.f32.mrb[35].mxu1 }
 0x280   : > { %1247 = vst [vmem:[%s2285_s14 + $0x100] sm:$0xff] %v1089_v48  ;;  %v1092_v28 = vadd.f32 %v2279_v20, %v1091_v27 }
 0x281   : > { %1250 = vst [vmem:[%s2285_s14 + $0x118] sm:$0xff] %v1100_v26 }
 0x282   : > { %1248 = vst [vmem:[%s2285_s14 + $0x108] sm:$0xff] %v1092_v28 }
 0x284   : > { %v1637_v29 = vpop.f32.mrb[36].mxu1 }
 0x285   : > { %v1113_v30 = vadd.f32 %v1637_v29, %v2279_v20  ;;  %v1104_v31 = vpop.f32.mrb[37].mxu1 }
 0x286   : > { %v1105_v32 = vadd.f32 %v2279_v20, %v1104_v31  ;;  %v1638_v33 = vpop.f32.mrb[38].mxu1 }
 0x287   : > { %1253 = vst [vmem:[%s2285_s14 + $0x130] sm:$0xff] %v1113_v30  ;;  %v1116_v34 = vadd.f32 %v1638_v33, %v2279_v20  ;;  %v1107_v35 = vpop.f32.mrb[39].mxu1 }
 0x288   : > { %1251 = vst [vmem:[%s2285_s14 + $0x120] sm:$0xff] %v1105_v32  ;;  %v1108_v36 = vadd.f32 %v2279_v20, %v1107_v35 }
 0x289   : > { %1254 = vst [vmem:[%s2285_s14 + $0x138] sm:$0xff] %v1116_v34 }
 0x28a   : > { %1252 = vst [vmem:[%s2285_s14 + $0x128] sm:$0xff] %v1108_v36 }
 0x28c   : > { %v1641_v37 = vpop.f32.mrb[40].mxu1 }
 0x28d   : > { %v1129_v38 = vadd.f32 %v1641_v37, %v2279_v20  ;;  %v1120_v39 = vpop.f32.mrb[41].mxu1 }
 0x28e   : > { %v1121_v40 = vadd.f32 %v2279_v20, %v1120_v39  ;;  %v1642_v41 = vpop.f32.mrb[42].mxu1 }
 0x28f   : > { %1257 = vst [vmem:[%s2285_s14 + $0x150] sm:$0xff] %v1129_v38  ;;  %v1132_v42 = vadd.f32 %v1642_v41, %v2279_v20  ;;  %v1123_v43 = vpop.f32.mrb[43].mxu1 }
 0x290   : > { %1255 = vst [vmem:[%s2285_s14 + $0x140] sm:$0xff] %v1121_v40  ;;  %v1124_v44 = vadd.f32 %v2279_v20, %v1123_v43 }
 0x291   : > { %1258 = vst [vmem:[%s2285_s14 + $0x158] sm:$0xff] %v1132_v42 }
 0x292   : > { %1256 = vst [vmem:[%s2285_s14 + $0x148] sm:$0xff] %v1124_v44 }
 0x294   : > { %v1645_v45 = vpop.f32.mrb[44].mxu1 }
 0x295   : > { %v1145_v46 = vadd.f32 %v1645_v45, %v2279_v20  ;;  %v1136_v47 = vpop.f32.mrb[45].mxu1 }
 0x296   : > { %v1137_v49 = vadd.f32 %v2279_v20, %v1136_v47  ;;  %v1646_v50 = vpop.f32.mrb[46].mxu1 }
 0x297   : > { %1261 = vst [vmem:[%s2285_s14 + $0x170] sm:$0xff] %v1145_v46  ;;  %v1148_v51 = vadd.f32 %v1646_v50, %v2279_v20  ;;  %v1139_v52 = vpop.f32.mrb[47].mxu1 }
 0x298   : > { %1259 = vst [vmem:[%s2285_s14 + $0x160] sm:$0xff] %v1137_v49  ;;  %v1140_v53 = vadd.f32 %v2279_v20, %v1139_v52 }
 0x299   : > { %1262 = vst [vmem:[%s2285_s14 + $0x178] sm:$0xff] %v1148_v51 }
 0x29a   : > { %1260 = vst [vmem:[%s2285_s14 + $0x168] sm:$0xff] %v1140_v53 }
 0x29c   : > { %v1649_v54 = vpop.f32.mrb[48].mxu1 }
 0x29d   : > { %v1161_v55 = vadd.f32 %v1649_v54, %v2279_v20  ;;  %v1152_v56 = vpop.f32.mrb[49].mxu1 }
 0x29e   : > { %v1153_v57 = vadd.f32 %v2279_v20, %v1152_v56  ;;  %v1650_v58 = vpop.f32.mrb[50].mxu1 }
 0x29f   : > { %1265 = vst [vmem:[%s2285_s14 + $0x190] sm:$0xff] %v1161_v55  ;;  %v1164_v59 = vadd.f32 %v1650_v58, %v2279_v20  ;;  %v1155_v60 = vpop.f32.mrb[51].mxu1 }
 0x2a0   : > { %1263 = vst [vmem:[%s2285_s14 + $0x180] sm:$0xff] %v1153_v57  ;;  %v1156_v61 = vadd.f32 %v2279_v20, %v1155_v60 }
 0x2a1   : > { %1266 = vst [vmem:[%s2285_s14 + $0x198] sm:$0xff] %v1164_v59 }
 0x2a2   : > { %1264 = vst [vmem:[%s2285_s14 + $0x188] sm:$0xff] %v1156_v61 }
 0x2a4   : > { %v1653_v62 = vpop.f32.mrb[52].mxu1 }
 0x2a5   : > { %v1177_v63 = vadd.f32 %v1653_v62, %v2279_v20  ;;  %v1168_v0 = vpop.f32.mrb[53].mxu1 }
 0x2a6   : > { %v1169_v1 = vadd.f32 %v2279_v20, %v1168_v0  ;;  %v1654_v2 = vpop.f32.mrb[54].mxu1 }
 0x2a7   : > { %1269 = vst [vmem:[%s2285_s14 + $0x1b0] sm:$0xff] %v1177_v63  ;;  %v1180_v3 = vadd.f32 %v1654_v2, %v2279_v20  ;;  %v1171_v4 = vpop.f32.mrb[55].mxu1 }
 0x2a8   : > { %1267 = vst [vmem:[%s2285_s14 + $0x1a0] sm:$0xff] %v1169_v1  ;;  %v1172_v5 = vadd.f32 %v2279_v20, %v1171_v4 }
 0x2a9   : > { %1270 = vst [vmem:[%s2285_s14 + $0x1b8] sm:$0xff] %v1180_v3 }
 0x2aa   : > { %1268 = vst [vmem:[%s2285_s14 + $0x1a8] sm:$0xff] %v1172_v5 }
 0x2ac   : > { %v1657_v6 = vpop.f32.mrb[56].mxu1 }
 0x2ad   : > { %v1193_v7 = vadd.f32 %v1657_v6, %v2279_v20  ;;  %v1184_v8 = vpop.f32.mrb[57].mxu1 }
 0x2ae   : > { %v1185_v9 = vadd.f32 %v2279_v20, %v1184_v8  ;;  %v1658_v10 = vpop.f32.mrb[58].mxu1 }
 0x2af   : > { %1273 = vst [vmem:[%s2285_s14 + $0x1d0] sm:$0xff] %v1193_v7  ;;  %v1196_v11 = vadd.f32 %v1658_v10, %v2279_v20  ;;  %v1187_v12 = vpop.f32.mrb[59].mxu1 }
 0x2b0   : > { %1271 = vst [vmem:[%s2285_s14 + $0x1c0] sm:$0xff] %v1185_v9  ;;  %v1188_v13 = vadd.f32 %v2279_v20, %v1187_v12 }
 0x2b1   : > { %1274 = vst [vmem:[%s2285_s14 + $0x1d8] sm:$0xff] %v1196_v11 }
 0x2b2   : > { %1272 = vst [vmem:[%s2285_s14 + $0x1c8] sm:$0xff] %v1188_v13 }
 0x2b4   : > { %v1661_v14 = vpop.f32.mrb[60].mxu1 }
 0x2b5   : > { %v1209_v15 = vadd.f32 %v1661_v14, %v2279_v20  ;;  %v1200_v16 = vpop.f32.mrb[61].mxu1 }
 0x2b6   : > { %v1201_v17 = vadd.f32 %v2279_v20, %v1200_v16  ;;  %v1662_v18 = vpop.f32.mrb[62].mxu1 }
 0x2b7   : > { %1277 = vst [vmem:[%s2285_s14 + $0x1f0] sm:$0xff] %v1209_v15  ;;  %v1212_v19 = vadd.f32 %v1662_v18, %v2279_v20  ;;  %v1203_v21 = vpop.f32.mrb[63].mxu1 }
 0x2b8   : > { %1275 = vst [vmem:[%s2285_s14 + $0x1e0] sm:$0xff] %v1201_v17  ;;  %v1204_v22 = vadd.f32 %v2279_v20, %v1203_v21 }
 0x2b9   : > { %1278 = vst [vmem:[%s2285_s14 + $0x1f8] sm:$0xff] %v1212_v19 }
 0x2ba   : > { %1276 = vst [vmem:[%s2285_s14 + $0x1e8] sm:$0xff] %v1204_v22 }
 0x2bb   : > { %1851 = shalt.err (!%p1848_p2)
}
 0x2bc   : > { %s1852_s9 = scalar_lea.hbm %s2414_s12, 8192  ;;  %s1856_s11 = scalar_lea.hbm %s2470_s6, 16384 }
 0x2bd   : > { %p1853_p13 = scmp.ne.s32.totalorder %s2414_s12, %s1852_s9  ;;  %p1857_p4 = scmp.lt.u32.totalorder %s2414_s12, %s2470_s6 }
 0x2be   : > { %p1858_p5 = scmp.lt.u32.totalorder %s1856_s11, %s1852_s9  ;;  %p1860_p11 = scmp.lt.u32.totalorder %s1852_s9, %s2414_s12 }
 0x2bf   : > { %p1854_p6 = pnand %p1853_p13, %p2484_p0 }
 0x2c0   : > { %p1859_p8 = por %p1858_p5, %p1857_p4 }
 0x2c1   : > { %p1855_p10 = pneg %p1854_p6 }
 0x2c2   : > { %p1861_p1 = por %p1860_p11, %p1859_p8 }
 0x2c4   : > { %p1862_p3 = pnand %p1861_p1, %p1855_p10 }
 0x2c6   : > { %1865 = shalt.err (!%p1862_p3)
}
 0x2c7   : > { %s1918_s30 = smov 128   ;;  %s1919_s18 = smov 8  }
 0x2c8   : > { %1673 = dma.vmem_to_hbm [thread:$0]  (%p2484_p0), %s2416_s8, 8192, %s2414_s12, %s1280_s24, %s1918_s30, %s1918_s30, %s1919_s18  }
 0x2c9 PF: > { %s1308_s19 = sand.u32 1, %s1896_s0   ;;  %p2485_p7 = scmp.ne.s32.totalorder %s2475_s27, 0 }
 0x2ca   : > { %p2486_p9 = scmp.ge.s32.totalorder %s1908_s23, 2  ;;  %s1309_s15 = scalar_lea.sflag [#allocation5], %s1308_s19 }
 0x2cc   : > { %p1687_p12 = pnand %p2486_p9, %p2485_p7 }
 0x2ce   : > { %1891 = dma.done.wait (!%p1687_p12), %s1309_s15, 8192  }
 0x2cf   : > { %1893 = vsyncadd (!%p1687_p12), %s1309_s15, 4294959104  ;;  %p21_p2 = scmp.ge.s32.totalorder %s2065_s17, 4   ;;  %s2487_s0 = smov %s1900_s21 }
 0x2d0   : > { %s2488_s21 = smov %s1904_s22  ;;  %s2489_s22 = smov %s2081_s29 }
 0x2d1   : > { %s2490_s23 = smov %s2065_s17  ;;  %23 = sbr.rel (!%p21_p2) target bundleno = 6 (0x6), region = 97 }
 0x2d8   :  { %1314 = vsyncpa [#allocation4], 1 }
 0x2d9   :  { %1316 = vsyncpa [#allocation4 + $0x1], 1 }
 0x2da   :  { %1317 = vsyncpa [#allocation7], 1 }
 0x2db   :  { %1318 = vsyncpa [#allocation5], 1 }
 0x2dc   :  { %1320 = vsyncpa [#allocation5 + $0x1], 1 }

</bundles_post_ra>
